<compile_context>
chip_gen: v7x
topology: tpu7x:2x2x1
jax: 0.10.0
libtpu: 0.0.40
codegen_flags: <defaults>
</compile_context>

<pallas_src>
import jax
import jax.numpy as jnp
from jax.experimental import pallas as pl
from jax.experimental.pallas import tpu as pltpu


def rdrop_kernel(kw_ref, l1_ref, l2_ref, tgt_ref, out_ref):
    # kw_ref:  SMEM (1,) float32    -> kl_weight
    # l1_ref:  VMEM (TM, C)         -> logits1 tile (any float dtype)
    # l2_ref:  VMEM (TM, C)         -> logits2 tile
    # tgt_ref: VMEM (TM, 1) int32   -> target class indices
    # out_ref: VMEM (TM, 1) float32 -> per-row loss
    l1 = l1_ref[...].astype(jnp.float32)
    l2 = l2_ref[...].astype(jnp.float32)
    tgt = tgt_ref[...]  # (TM, 1) int32
    tm, c = l1.shape

    # Numerically-stable softmax pieces, one exp per element per side.
    m1 = jnp.max(l1, axis=-1, keepdims=True)
    z1 = l1 - m1
    e1 = jnp.exp(z1)
    s1 = jnp.sum(e1, axis=-1, keepdims=True)         # (tm, 1)
    logs1 = jnp.log(s1)                              # (tm, 1)
    p1 = e1 * pl.reciprocal(s1, approx=False)        # reciprocal on (tm,1), mul on tile

    m2 = jnp.max(l2, axis=-1, keepdims=True)
    z2 = l2 - m2
    e2 = jnp.exp(z2)
    s2 = jnp.sum(e2, axis=-1, keepdims=True)
    logs2 = jnp.log(s2)
    p2 = e2 * pl.reciprocal(s2, approx=False)

    # Cross entropy, both sides fused, without materializing logp1/logp2:
    #   logp_k = z_k - log s_k
    #   0.5*(ce1+ce2) = 0.5*((log s1 + log s2) - (z1[t] + z2[t]))
    lane = jax.lax.broadcasted_iota(jnp.int32, (tm, c), 1)
    zsum_t = jnp.sum(jnp.where(lane == tgt, z1 + z2, 0.0),
                     axis=-1, keepdims=True)
    ce = 0.5 * ((logs1 + logs2) - zsum_t)

    # Symmetric KL, fused:
    #   0.5*(KL(p2||p1)+KL(p1||p2)) = 0.5*sum((p1-p2)*(logp1-logp2))
    #   logp1 - logp2 = (z1 - z2) - (log s1 - log s2)
    kl = 0.5 * jnp.sum((p1 - p2) * ((z1 - z2) - (logs1 - logs2)),
                       axis=-1, keepdims=True)

    out_ref[...] = ce + kw_ref[0] * kl


def _chip_budget():
    """(f32 tile-byte target, vmem cap) sized per TPU generation."""
    try:
        vmem = pltpu.get_tpu_info().vmem_capacity_bytes
    except Exception:
        vmem = 64 * 1024 * 1024  # unknown -> assume the smallest (v7x-like)
    if vmem >= 100 * 1024 * 1024:
        # v5e / v6e: 128 MiB physical VMEM -> bigger tiles, higher cap.
        return 4 * 1024 * 1024, 96 * 1024 * 1024
    # v7x: 64 MiB physical VMEM -> conservative.
    return 2 * 1024 * 1024, 40 * 1024 * 1024


def _pick_tm(N, C, dtype, target_f32_bytes):
    """Row tile: ~target bytes of f32 work per (tm, C) tile, >=2 grid steps."""
    pack = 16 if jnp.dtype(dtype) == jnp.dtype(jnp.bfloat16) else 8
    tm = target_f32_bytes // max(1, C * 4)
    tm = min(tm, 32768)                       # generous ceiling, no 2048 cap
    tm = max(pack, (tm // pack) * pack)

    n_ceil = ((N + pack - 1) // pack) * pack
    if tm >= n_ceil:
        # Whole batch fits one tile. If possible, split into ~2 tiles so the
        # "parallel" grid axis can be sharded across v7x's 2 TensorCores.
        if n_ceil >= 2 * pack:
            half = (n_ceil + 1) // 2
            tm = max(pack, ((half + pack - 1) // pack) * pack)
        else:
            tm = n_ceil
    return tm


def rdrop_loss(logits1, logits2, target, kl_weight=1.0, tm=None):
    """Pallas-backed RDrop forward. logits: [N, C], target: [N] int -> loss [N]."""
    N, C = logits1.shape
    tile_target, vmem_cap = _chip_budget()
    if tm is None:
        tm = _pick_tm(N, C, logits1.dtype, tile_target)

    # TODO(synk): vocab-scale C (>=64K) on v7x should split C across a second
    # "arbitrary" grid axis with an online-softmax accumulator instead of one
    # full-row tile; not needed for the class counts this module targets.

    tgt2d = target.astype(jnp.int32).reshape(N, 1)
    kw = jnp.array([float(kl_weight)], dtype=jnp.float32)
    grid = (pl.cdiv(N, tm),)   # partial last block handled by Pallas (no pad)

    # VMEM budget: 2 logits inputs x 2 pipeline buffers (input dtype) plus the
    # live f32 temporaries inside the kernel, with headroom; capped per chip.
    in_itemsize = jnp.dtype(logits1.dtype).itemsize
    tile_elems = tm * C
    vmem_need = (4 * tile_elems * in_itemsize     # double-buffered logits tiles
                 + 10 * tile_elems * 4            # live f32 temporaries
                 + (2 << 20))                     # targets/out/compiler scratch
    vmem_limit = int(min(vmem_cap, max(16 << 20, vmem_need)))

    cost = pl.CostEstimate(
        flops=int(15 * N * C),
        transcendentals=int(2 * N * C + 6 * N),
        bytes_accessed=int(2 * N * C * in_itemsize + 2 * N * 4),
    )

    out = pl.pallas_call(
        rdrop_kernel,
        out_shape=jax.ShapeDtypeStruct((N, 1), jnp.float32),
        grid=grid,
        in_specs=[
            pl.BlockSpec(memory_space=pltpu.SMEM),        # kl_weight scalar
            pl.BlockSpec((tm, C), lambda i: (i, 0)),      # logits1 tile
            pl.BlockSpec((tm, C), lambda i: (i, 0)),      # logits2 tile
            pl.BlockSpec((tm, 1), lambda i: (i, 0)),      # targets
        ],
        out_specs=pl.BlockSpec((tm, 1), lambda i: (i, 0)),
        compiler_params=pltpu.CompilerParams(
            dimension_semantics=("parallel",),
            vmem_limit_bytes=vmem_limit),
        cost_estimate=cost,
    )(kw, logits1, logits2, tgt2d)
    return out[:, 0]


def rdrop_loss_ref(logits1, logits2, target, kl_weight=1.0):
    """Pure-JAX reference mirroring the PyTorch module."""
    logits1 = logits1.astype(jnp.float32)
    logits2 = logits2.astype(jnp.float32)
    logp1 = jax.nn.log_softmax(logits1, axis=-1)
    logp2 = jax.nn.log_softmax(logits2, axis=-1)
    p1, p2 = jnp.exp(logp1), jnp.exp(logp2)
    ce1 = -jnp.take_along_axis(logp1, target[:, None], axis=-1)[:, 0]
    ce2 = -jnp.take_along_axis(logp2, target[:, None], axis=-1)[:, 0]
    ce = 0.5 * (ce1 + ce2)
    kl1 = jnp.sum(p2 * (logp2 - logp1), axis=-1)
    kl2 = jnp.sum(p1 * (logp1 - logp2), axis=-1)
    return ce + kl_weight * 0.5 * (kl1 + kl2)


if __name__ == "__main__":
    key = jax.random.PRNGKey(0)
    k1, k2, k3 = jax.random.split(key, 3)

    # Small shapes consistent with the module's forward (batch of class logits).
    N, C = 8, 16
    logits1 = jax.random.normal(k1, (N, C), dtype=jnp.float32)
    logits2 = jax.random.normal(k2, (N, C), dtype=jnp.float32)
    target = jax.random.randint(k3, (N,), 0, C, dtype=jnp.int32)
    kl_weight = 1.0

    loss = rdrop_loss(logits1, logits2, target, kl_weight)
    jax.block_until_ready(loss)
    ref = rdrop_loss_ref(logits1, logits2, target, kl_weight)
    assert loss.shape == (N,)
    assert jnp.allclose(loss, ref, atol=1e-5, rtol=1e-5), (loss, ref)

    # Ragged batch (N not a multiple of the tile): exercises the partial last
    # block path (no wrapper padding) and a grid with >= 2 steps.
    N2 = 20
    k4, k5, k6 = jax.random.split(jax.random.PRNGKey(1), 3)
    l1b = jax.random.normal(k4, (N2, C), dtype=jnp.float32)
    l2b = jax.random.normal(k5, (N2, C), dtype=jnp.float32)
    tb = jax.random.randint(k6, (N2,), 0, C, dtype=jnp.int32)
    loss2 = rdrop_loss(l1b, l2b, tb, 0.5)
    jax.block_until_ready(loss2)
    ref2 = rdrop_loss_ref(l1b, l2b, tb, 0.5)
    assert loss2.shape == (N2,)
    assert jnp.allclose(loss2, ref2, atol=1e-5, rtol=1e-5), (loss2, ref2)

    # bf16 logits path (halved HBM read bytes; upcast to f32 inside the kernel).
    N3 = 32
    k7, k8, k9 = jax.random.split(jax.random.PRNGKey(2), 3)
    l1c = jax.random.normal(k7, (N3, C), dtype=jnp.bfloat16)
    l2c = jax.random.normal(k8, (N3, C), dtype=jnp.bfloat16)
    tc = jax.random.randint(k9, (N3,), 0, C, dtype=jnp.int32)
    loss3 = rdrop_loss(l1c, l2c, tc, 2.0)
    jax.block_until_ready(loss3)
    ref3 = rdrop_loss_ref(l1c, l2c, tc, 2.0)
    assert loss3.shape == (N3,)
    assert jnp.allclose(loss3, ref3, atol=1e-5, rtol=1e-5), (loss3, ref3)

    print("KERNEL_OK")
</pallas_src>

<mosaic_0001>
module attributes {stable_mosaic.version = 11 : i64} {
  func.func @rdrop_kernel(%arg0: i32, %arg1: memref<1xf32, #tpu.memory_space<smem>>, %arg2: memref<8x16xf32, #tpu.memory_space<vmem>>, %arg3: memref<8x16xf32, #tpu.memory_space<vmem>>, %arg4: memref<8x1xi32, #tpu.memory_space<vmem>>, %arg5: memref<8x1xf32, #tpu.memory_space<vmem>>) attributes {dimension_semantics = [#tpu.dimension_semantics<parallel>], iteration_bounds = array<i64: 1>, scalar_prefetch = 0 : i64, scratch_operands = 0 : i64, tpu.core_type = #tpu.core_type<tc>, window_params = [{transform_indices = @transform_0, window_bounds = array<i64: 1>}, {transform_indices = @transform_1, window_bounds = array<i64: 8, 16>}, {transform_indices = @transform_2, window_bounds = array<i64: 8, 16>}, {transform_indices = @transform_3, window_bounds = array<i64: 8, 1>}, {transform_indices = @transform_4, window_bounds = array<i64: 8, 1>}]} {
    %c0 = arith.constant 0 : index
    %c0_0 = arith.constant 0 : index
    %0 = vector.load %arg2[%c0, %c0_0] : memref<8x16xf32, #tpu.memory_space<vmem>>, vector<8x16xf32>
    %c0_1 = arith.constant 0 : index
    %c0_2 = arith.constant 0 : index
    %1 = vector.load %arg3[%c0_1, %c0_2] : memref<8x16xf32, #tpu.memory_space<vmem>>, vector<8x16xf32>
    %c0_3 = arith.constant 0 : index
    %c0_4 = arith.constant 0 : index
    %2 = vector.load %arg4[%c0_3, %c0_4] : memref<8x1xi32, #tpu.memory_space<vmem>>, vector<8x1xi32>
    %cst = arith.constant dense<0xFF800000> : vector<8xf32>
    %3 = vector.multi_reduction <maximumf>, %0, %cst [1] : vector<8x16xf32> to vector<8xf32>
    %4 = vector.shape_cast %3 : vector<8xf32> to vector<8x1xf32>
    %5 = vector.broadcast %4 : vector<8x1xf32> to vector<8x16xf32>
    %6 = arith.subf %0, %5 : vector<8x16xf32>
    %7 = math.exp %6 : vector<8x16xf32>
    %cst_5 = arith.constant dense<0.000000e+00> : vector<8xf32>
    %8 = vector.multi_reduction <add>, %7, %cst_5 [1] : vector<8x16xf32> to vector<8xf32>
    %9 = vector.shape_cast %8 : vector<8xf32> to vector<8x1xf32>
    %10 = math.log %9 : vector<8x1xf32>
    %11 = tpu.reciprocal %9 : vector<8x1xf32> -> vector<8x1xf32>
    %12 = vector.broadcast %11 : vector<8x1xf32> to vector<8x16xf32>
    %13 = arith.mulf %7, %12 : vector<8x16xf32>
    %cst_6 = arith.constant dense<0xFF800000> : vector<8xf32>
    %14 = vector.multi_reduction <maximumf>, %1, %cst_6 [1] : vector<8x16xf32> to vector<8xf32>
    %15 = vector.shape_cast %14 : vector<8xf32> to vector<8x1xf32>
    %16 = vector.broadcast %15 : vector<8x1xf32> to vector<8x16xf32>
    %17 = arith.subf %1, %16 : vector<8x16xf32>
    %18 = math.exp %17 : vector<8x16xf32>
    %cst_7 = arith.constant dense<0.000000e+00> : vector<8xf32>
    %19 = vector.multi_reduction <add>, %18, %cst_7 [1] : vector<8x16xf32> to vector<8xf32>
    %20 = vector.shape_cast %19 : vector<8xf32> to vector<8x1xf32>
    %21 = math.log %20 : vector<8x1xf32>
    %22 = tpu.reciprocal %20 : vector<8x1xf32> -> vector<8x1xf32>
    %23 = vector.broadcast %22 : vector<8x1xf32> to vector<8x16xf32>
    %24 = arith.mulf %18, %23 : vector<8x16xf32>
    %25 = tpu.iota {dimensions = array<i32: 1>} : vector<8x16xi32>
    %26 = vector.broadcast %2 : vector<8x1xi32> to vector<8x16xi32>
    %27 = arith.cmpi eq, %25, %26 : vector<8x16xi32>
    %28 = arith.addf %6, %17 : vector<8x16xf32>
    %cst_8 = arith.constant 0.000000e+00 : f32
    %29 = vector.broadcast %cst_8 : f32 to vector<8x16xf32>
    %30 = arith.select %27, %28, %29 : vector<8x16xi1>, vector<8x16xf32>
    %cst_9 = arith.constant dense<0.000000e+00> : vector<8xf32>
    %31 = vector.multi_reduction <add>, %30, %cst_9 [1] : vector<8x16xf32> to vector<8xf32>
    %32 = vector.shape_cast %31 : vector<8xf32> to vector<8x1xf32>
    %33 = arith.addf %10, %21 : vector<8x1xf32>
    %34 = arith.subf %33, %32 : vector<8x1xf32>
    %cst_10 = arith.constant 5.000000e-01 : f32
    %35 = vector.broadcast %cst_10 : f32 to vector<8x1xf32>
    %36 = arith.mulf %35, %34 : vector<8x1xf32>
    %37 = arith.subf %13, %24 : vector<8x16xf32>
    %38 = arith.subf %6, %17 : vector<8x16xf32>
    %39 = arith.subf %10, %21 : vector<8x1xf32>
    %40 = vector.broadcast %39 : vector<8x1xf32> to vector<8x16xf32>
    %41 = arith.subf %38, %40 : vector<8x16xf32>
    %42 = arith.mulf %37, %41 : vector<8x16xf32>
    %cst_11 = arith.constant dense<0.000000e+00> : vector<8xf32>
    %43 = vector.multi_reduction <add>, %42, %cst_11 [1] : vector<8x16xf32> to vector<8xf32>
    %44 = vector.shape_cast %43 : vector<8xf32> to vector<8x1xf32>
    %cst_12 = arith.constant 5.000000e-01 : f32
    %45 = vector.broadcast %cst_12 : f32 to vector<8x1xf32>
    %46 = arith.mulf %45, %44 : vector<8x1xf32>
    %c0_13 = arith.constant 0 : index
    %47 = memref.load %arg1[%c0_13] : memref<1xf32, #tpu.memory_space<smem>>
    %48 = vector.broadcast %47 : f32 to vector<8x1xf32>
    %49 = arith.mulf %48, %46 : vector<8x1xf32>
    %50 = arith.addf %36, %49 : vector<8x1xf32>
    %c0_14 = arith.constant 0 : index
    %c0_15 = arith.constant 0 : index
    %51 = vector.load %arg5[%c0_14, %c0_15] : memref<8x1xf32, #tpu.memory_space<vmem>>, vector<8x1xf32>
    tpu.vector_store %arg5[%c0_14, %c0_15], %50 {strides = array<i32>} : memref<8x1xf32, #tpu.memory_space<vmem>>, vector<8x1xf32>,
    return
  }
  func.func @transform_0(%arg0: i32) -> i32 {
    %c0_i32 = arith.constant 0 : i32
    %c0_i32_0 = arith.constant 0 : i32
    return %c0_i32 : i32
  }
  func.func @transform_1(%arg0: i32) -> (i32, i32) {
    %c0_i32 = arith.constant 0 : i32
    %c0_i32_0 = arith.constant 0 : i32
    return %arg0, %c0_i32 : i32, i32
  }
  func.func @transform_2(%arg0: i32) -> (i32, i32) {
    %c0_i32 = arith.constant 0 : i32
    %c0_i32_0 = arith.constant 0 : i32
    return %arg0, %c0_i32 : i32, i32
  }
  func.func @transform_3(%arg0: i32) -> (i32, i32) {
    %c0_i32 = arith.constant 0 : i32
    %c0_i32_0 = arith.constant 0 : i32
    return %arg0, %c0_i32 : i32, i32
  }
  func.func @transform_4(%arg0: i32) -> (i32, i32) {
    %c0_i32 = arith.constant 0 : i32
    %c0_i32_0 = arith.constant 0 : i32
    return %arg0, %c0_i32 : i32, i32
  }
}

</mosaic_0001>

<bundles_post_ra>
// kernel: tpu_custom_call.1
= control target key start
LH: loop header
LB: loop body
LE: loop exit
PB: predicated region body
PF: predicated region fallthrough
CT: control target
= control target key end

     0   :  { %vm21_vm0 = vcmask 130048   ;;  %v95_v2 = vmov 0   ;;  %v48_v13 = vlaneseq  ;;  %vm75_vm2 = vcmask 7168   ;;  %s142_s1 = inlined_call_operand.vmem [shape: f32[8,16], index: 1, kind: input, shape index: {}]   ;;  %s143_s2 = inlined_call_operand.vmem [shape: f32[8,16], index: 2, kind: input, shape index: {}]   ;;  %s144_s3 = inlined_call_operand.vmem [shape: s32[8,1], index: 3, kind: input, shape index: {}]   ;;  %s145_s0 = inlined_call_operand.<no memory space> [shape: f32[1], index: 0, kind: input, shape index: {}]   ;;  %s146_s4 = inlined_call_operand.vmem [shape: f32[8,1], index: 4, kind: output, shape index: {}]  }
   0x1   :  { %v18_v0 = vld [vmem:[%s142_s1] sm:$0xff]  ;;  %82 = vset.pattern.permute.xlu0 %v95_v2  ;;  %v72_v42 = vstv %s145_s0 }
   0x2   :  { %v19_v1 = vld [vmem:[%s143_s2] sm:$0xff]  ;;  %v22_v3 = vsel %vm21_vm0, %v18_v0, -inf  ;;  %v49_v14 = vand.u32 127, %v48_v13 }
   0x3   :  { %23 = vmax.xlane.f32.xlu0 %v22_v3  ;;  %v35_v4 = vsel %vm21_vm0, %v19_v1, -inf  ;;  %v20_v5 = vld [vmem:[%s144_s3] sm:$0xff] }
   0x7   :  { %36 = vmax.xlane.f32.xlu0 %v35_v4 }
  0x1d   :  { %51 = vperm.xlu0 %82, %v20_v5  }
  0x90   :  { %v24_v6 = vpop.xlane.xlu0 %23 }
  0x91   :  { %v25_v7 = vsub.f32 %v18_v0, %v24_v6 }
  0x93   :  { %v26_v8 = vmul.f32 1.442695, %v25_v7 }
  0x94   :  { %v37_v9 = vpop.xlane.xlu0 %36 }
  0x95   :  { %83 = vpow2.f32 %v26_v8  ;;  %v38_v10 = vsub.f32 %v19_v1, %v37_v9 }
  0x97   :  { %v39_v11 = vmul.f32 1.442695, %v38_v10  ;;  %v63_v12 = vsub.f32 %v25_v7, %v38_v10  ;;  %v54_v19 = vadd.f32 %v38_v10, %v25_v7 }
  0x99   :  { %85 = vpow2.f32 %v39_v11 }
  0x9c   :  { %v52_v16 = vpop.permute.xlu0 %51 }
  0x9d   :  { %vm53_vm1 = vcmp.eq.s32.totalorder %v49_v14, %v52_v16 }
  0x9e   :  { %v55_v21 = vsel %vm53_vm1, %v54_v19, 0.0 }
  0x9f   :  { %v84_v15 = vpop.eup %83  ;;  %v56_v22 = vsel %vm21_vm0, %v55_v21, 0.0 }
  0xa0   :  { %v28_v17 = vsel %vm21_vm0, %v84_v15, 0.0 }
  0xa1   :  { %29 = vadd.xlane.f32.xlu1 %v28_v17 }
  0xa3   :  { %v86_v18 = vpop.eup %85 }
  0xa4   :  { %v41_v20 = vsel %vm21_vm0, %v86_v18, 0.0 }
  0xa5   :  { %42 = vadd.xlane.f32.xlu1 %v41_v20 }
  0xa9   :  { %57 = vadd.xlane.f32.xlu1 %v56_v22 }
 0x12e   :  { %v30_v23 = vpop.xlane.xlu1 %29 }
 0x12f   :  { %87 = vlog2.f32 %v30_v23 }
 0x130   :  { %89 = vrcp.f32 %v30_v23 }
 0x132   :  { %v43_v24 = vpop.xlane.xlu1 %42 }
 0x133   :  { %91 = vlog2.f32 %v43_v24 }
 0x134   :  { %93 = vrcp.f32 %v43_v24 }
 0x136   :  { %v58_v39 = vpop.xlane.xlu1 %57 }
 0x139   :  { %v88_v25 = vpop.eup %87 }
 0x13a   :  { %v90_v26 = vpop.eup %89  ;;  %v32_v29 = vmul.f32 0.6931472, %v88_v25 }
 0x13b   :  { %v34_v33 = vmul.f32 %v90_v26, %v84_v15 }
 0x13d   :  { %v92_v27 = vpop.eup %91 }
 0x13e   :  { %v94_v28 = vpop.eup %93  ;;  %v45_v30 = vmul.f32 0.6931472, %v92_v27 }
 0x13f   :  { %v47_v31 = vmul.f32 %v94_v28, %v86_v18 }
 0x140   :  { %v59_v32 = vadd.f32 %v45_v30, %v32_v29  ;;  %v64_v34 = vsub.f32 %v32_v29, %v45_v30 }
 0x141   :  { %v62_v35 = vsub.f32 %v34_v33, %v47_v31 }
 0x142   :  { %v65_v36 = vsub.f32 %v63_v12, %v64_v34  ;;  %v60_v40 = vsub.f32 %v59_v32, %v58_v39 }
 0x144   :  { %v66_v37 = vmul.f32 %v65_v36, %v62_v35  ;;  %v61_v44 = vmul.f32 0.5, %v60_v40 }
 0x146   :  { %v67_v38 = vsel %vm21_vm0, %v66_v37, 0.0 }
 0x147   :  { %68 = vadd.xlane.f32.xlu1 %v67_v38 }
 0x1d4   :  { %v69_v41 = vpop.xlane.xlu1 %68 }
 0x1d5   :  { %v70_v43 = vmul.f32 0.5, %v69_v41 }
 0x1d7   :  { %v73_v45 = vmul.f32 %v72_v42, %v70_v43 }
 0x1d9   :  { %v74_v46 = vadd.f32 %v73_v45, %v61_v44 }
 0x1db   :  { %76 = vst.msk [vmem:[%s146_s4] sm:$0xff] %vm75_vm2, %v74_v46 }

</bundles_post_ra>
